<compile_context>
chip_gen: v6e
topology: v6e:2x2x1
jax: 0.10.0
libtpu: 0.0.40
codegen_flags: <defaults>
</compile_context>

<pallas_src>
import math

import jax
import jax.numpy as jnp
from jax.experimental import pallas as pl
from jax.experimental.pallas import tpu as pltpu

_LANES = 128
_SUBLANES = 8


def _identity_copy_kernel(x_ref, o_ref):
    # Straight VMEM tile copy: DMA in, DMA out, nothing on the VPU/MXU.
    o_ref[...] = x_ref[...]


def identity_pallas(x, *, target_block_bytes=2 << 20):
    """Identity forward pass: returns a tensor equal to `x` (same shape/dtype)."""
    orig_shape = x.shape
    orig_dtype = x.dtype
    total = int(math.prod(orig_shape)) if orig_shape else 1
    if total == 0:
        return x  # nothing to copy

    itemsize = jnp.dtype(orig_dtype).itemsize
    chunk = _LANES * _SUBLANES  # pad so the 2-D view is (8,128)-tileable

    flat = jnp.ravel(x)
    padded = pl.cdiv(total, chunk) * chunk
    if padded != total:
        flat = jnp.pad(flat, (0, padded - total))

    rows = padded // _LANES                      # multiple of 8 by construction
    x2 = flat.reshape(rows, _LANES)              # lane-dense 2-D slab

    # Largest row-block that keeps one buffer ~target_block_bytes
    # (double-buffered in+out => ~4x that in VMEM, well under scoped limits).
    rows_per_block = max(_SUBLANES,
                         (target_block_bytes // (_LANES * itemsize))
                         // _SUBLANES * _SUBLANES)
    block_rows = int(min(rows, rows_per_block))
    grid = (pl.cdiv(rows, block_rows),)

    block_bytes = block_rows * _LANES * itemsize
    vmem_limit = min(128 << 20, max(4 << 20, 6 * block_bytes))

    out2 = pl.pallas_call(
        _identity_copy_kernel,
        out_shape=jax.ShapeDtypeStruct((rows, _LANES), x2.dtype),
        grid_spec=pl.GridSpec(
            grid=grid,
            in_specs=[pl.BlockSpec((block_rows, _LANES), lambda i: (i, 0))],
            out_specs=pl.BlockSpec((block_rows, _LANES), lambda i: (i, 0)),
        ),
        compiler_params=pltpu.CompilerParams(
            dimension_semantics=("parallel",),
            vmem_limit_bytes=int(vmem_limit),
        ),
        cost_estimate=pl.CostEstimate(
            flops=0,
            transcendentals=0,
            bytes_accessed=2 * padded * itemsize,
        ),
    )(x2)

    out = out2.reshape(-1)[:total].reshape(orig_shape)
    return out.astype(orig_dtype)


if __name__ == "__main__":
    key = jax.random.PRNGKey(0)
    # Small shapes consistent with the module: batch=2, channels=4, 16x16 spatial.
    x = jax.random.normal(key, (2, 4, 16, 16), jnp.float32)

    y = identity_pallas(x)
    jax.block_until_ready(y)

    assert y.shape == x.shape, (y.shape, x.shape)
    assert y.dtype == x.dtype, (y.dtype, x.dtype)
    assert bool(jnp.all(y == x)), "identity kernel must return x exactly"
    print("KERNEL_OK")
</pallas_src>

<mosaic_0001>
module attributes {stable_mosaic.version = 11 : i64} {
  func.func @_identity_copy_kernel(%arg0: i32, %arg1: memref<16x128xf32, #tpu.memory_space<vmem>>, %arg2: memref<16x128xf32, #tpu.memory_space<vmem>>) attributes {dimension_semantics = [#tpu.dimension_semantics<parallel>], iteration_bounds = array<i64: 1>, scalar_prefetch = 0 : i64, scratch_operands = 0 : i64, tpu.core_type = #tpu.core_type<tc>, window_params = [{transform_indices = @transform_0, window_bounds = array<i64: 16, 128>}, {transform_indices = @transform_1, window_bounds = array<i64: 16, 128>}]} {
    %c0 = arith.constant 0 : index
    %c0_0 = arith.constant 0 : index
    %0 = vector.load %arg1[%c0, %c0_0] : memref<16x128xf32, #tpu.memory_space<vmem>>, vector<16x128xf32>
    %c0_1 = arith.constant 0 : index
    %c0_2 = arith.constant 0 : index
    %1 = vector.load %arg2[%c0_1, %c0_2] : memref<16x128xf32, #tpu.memory_space<vmem>>, vector<16x128xf32>
    tpu.vector_store %arg2[%c0_1, %c0_2], %0 {strides = array<i32>} : memref<16x128xf32, #tpu.memory_space<vmem>>, vector<16x128xf32>,
    return
  }
  func.func @transform_0(%arg0: i32) -> (i32, i32) {
    %c0_i32 = arith.constant 0 : i32
    %c0_i32_0 = arith.constant 0 : i32
    return %arg0, %c0_i32 : i32, i32
  }
  func.func @transform_1(%arg0: i32) -> (i32, i32) {
    %c0_i32 = arith.constant 0 : i32
    %c0_i32_0 = arith.constant 0 : i32
    return %arg0, %c0_i32 : i32, i32
  }
}

</mosaic_0001>

<bundles_post_ra>
// kernel: tpu_custom_call.1
= control target key start
LH: loop header
LB: loop body
LE: loop exit
PB: predicated region body
PF: predicated region fallthrough
CT: control target
= control target key end

     0   :  { %6 = vsyncpa [#allocation3], 0  ;;  %s112_s0 = inlined_call_operand.hbm [shape: f32[16,128], index: 0, kind: input, shape index: {}]   ;;  %s113_s1 = inlined_call_operand.hbm [shape: f32[16,128], index: 1, kind: output, shape index: {}]  }
   0x1   :  { %7 = vsyncpa [#allocation4], 0  ;;  %s92_s6 = smov [#allocation2]  }
   0x2   :  { %s13_s7 = sshll.u32 %s92_s6, 4  ;;  %s14_s7 = int_to_ptr.vmem [resolvable:$true] %s13_s7 }
   0x3   :  { %s56_s8 = scalar_lea.vmem %s14_s7, 256  ;;  %p61_p1 = scmp.lt.s32.totalorder %s14_s7, %s14_s7 }
   0x4   :  { %p57_p0 = scmp.ne.s32.totalorder %s14_s7, %s56_s8  ;;  %p62_p2 = scmp.lt.s32.totalorder %s56_s8, %s56_s8 }
   0x6   :  { %p63_p3 = por %p62_p2, %p61_p1 }
   0x8   :  { %p64_p4 = pnand %p63_p3, %p57_p0 }
   0xa   :  { %67 = shalt.err (!%p64_p4)
}
   0xb   :  { %s93_s9 = smov 128   ;;  %s94_s10 = smov 8  }
   0xc   :  { %19 = dma.hbm_to_vmem [thread:$0]  %s112_s0, 256, %s14_s7, [#allocation3], %s93_s9, %s93_s9, %s94_s10  }
   0xd   :  { %88 = dma.done.wait [#allocation3], 256  }
   0xe   :  { %89 = vsyncadd [#allocation3], 4294967040  ;;  %s95_s13 = smov [#allocation5]   ;;  %v23_v0 = vld [vmem:[#allocation2] sm:$0xff]  ;;  %v24_v1 = vld [vmem:[#allocation2 + $0x8] sm:$0xff] }
   0xf   :  { %s32_s14 = sshll.u32 %s95_s13, 4  ;;  %25 = vst [vmem:[#allocation5] sm:$0xff] %v23_v0  ;;  %26 = vst [vmem:[#allocation5 + $0x8] sm:$0xff] %v24_v1  ;;  %s33_s14 = int_to_ptr.vmem [resolvable:$true] %s32_s14 }
  0x10   :  { %s68_s15 = scalar_lea.vmem %s33_s14, 256  ;;  %p73_p6 = scmp.lt.s32.totalorder %s33_s14, %s33_s14 }
  0x11   :  { %p69_p5 = scmp.ne.s32.totalorder %s33_s14, %s68_s15  ;;  %p74_p7 = scmp.lt.s32.totalorder %s68_s15, %s68_s15 }
  0x13   :  { %p75_p8 = por %p74_p7, %p73_p6 }
  0x15   :  { %p76_p9 = pnand %p75_p8, %p69_p5 }
  0x17   :  { %79 = shalt.err (!%p76_p9)
}
  0x18   :  { %38 = dma.vmem_to_hbm [thread:$0]  %s33_s14, 256, %s113_s1, [#allocation4], %s93_s9, %s93_s9, %s94_s10  }
  0x19   :  { %90 = dma.done.wait [#allocation4], 256  }
  0x1a   :  { %91 = vsyncadd [#allocation4], 4294967040 }
  0x1b   :  { %42 = vsyncpa [#allocation3], 1 }
  0x1c   :  { %43 = vsyncpa [#allocation4], 1 }

</bundles_post_ra>
